<compile_context>
chip_gen: v6e
topology: v6e:2x2x1
jax: 0.10.0
libtpu: 0.0.40
codegen_flags: <defaults>
</compile_context>

<pallas_src>
import jax
import jax.numpy as jnp
import numpy as np
from jax.experimental import pallas as pl
from jax.experimental.pallas import tpu as pltpu


def _swish(v):
    return v * jax.nn.sigmoid(v)


def vae_kernel(
    x0_ref, x1_ref, y_ref, eps_ref,
    w1x0_ref, w1x1_ref, w1y_ref, b1_ref,
    w2_ref, b2_ref,
    w3f_ref, b3f_ref,
    wzf_ref, wd1y_ref, bd1_ref,
    wd2_ref, bd2_ref, wd3_ref, bd3_ref,
    wd4p_ref, bd4p_ref,
    wmy_ref, bm_ref, wpy_ref, bp_ref,
    mulv_ref, slab_ref,
):
    f32 = jnp.float32
    image_dim = x0_ref.shape[1]
    hidden = w2_ref.shape[0]
    latent = wzf_ref.shape[0]

    x0 = x0_ref[...]
    x1 = x1_ref[...]
    y = y_ref[...]

    # --- encoder fc1: hstack((x0, x1, y)) realized as split weights
    #     (x0 part on the MXU, x1/y as rank-1 VPU adds) ---
    h = _swish(jnp.dot(x0, w1x0_ref[...], preferred_element_type=f32)
               + x1 * w1x1_ref[...] + y * w1y_ref[...] + b1_ref[...])
    h = _swish(jnp.dot(h, w2_ref[...], preferred_element_type=f32) + b2_ref[...])

    # --- fused encoder heads fc31|fc32: one matmul, lane-dense [mu | logvar] ---
    mulv = jnp.dot(h, w3f_ref[...], preferred_element_type=f32) + b3f_ref[...]
    mulv_ref[...] = mulv
    mu = mulv[:, :latent]
    logvar = mulv[:, latent:]

    # --- reparameterization (training mode), eps supplied by wrapper ---
    z = mu + eps_ref[...] * jnp.exp(0.5 * logvar)

    # --- fused z-consumer matmul: columns = [x0_decoder.fc1 | x1_mu | x1_logprec] ---
    zw = jnp.dot(z, wzf_ref[...], preferred_element_type=f32)      # (TB, hidden + 2)
    d = _swish(zw[:, :hidden] + y * wd1y_ref[...] + bd1_ref[...])
    x1_mu = zw[:, hidden:hidden + 1] + y * wmy_ref[...] + bm_ref[...]
    x1_lp = zw[:, hidden + 1:hidden + 2] + y * wpy_ref[...] + bp_ref[...]

    d = _swish(jnp.dot(d, wd2_ref[...], preferred_element_type=f32) + bd2_ref[...])
    d = _swish(jnp.dot(d, wd3_ref[...], preferred_element_type=f32) + bd3_ref[...])

    # --- final decoder layer with zero-padded weights -> lane-dense output slab ---
    slab = jnp.dot(d, wd4p_ref[...], preferred_element_type=f32) + bd4p_ref[...]
    lane = jax.lax.broadcasted_iota(jnp.int32, slab.shape, 1)
    slab = jnp.where(lane == image_dim, x1_mu, slab)       # insert x1_mu at lane image_dim
    slab = jnp.where(lane == image_dim + 1, x1_lp, slab)   # insert x1_logprec next to it
    slab_ref[...] = slab


# ---------------------------------------------------------------------------
# parameters (PyTorch nn.Linear semantics, weights stored pre-transposed (in, out))
# ---------------------------------------------------------------------------
def _linear_params(key, fan_in, fan_out):
    kw, kb = jax.random.split(key)
    bound = 1.0 / np.sqrt(fan_in)
    w = jax.random.uniform(kw, (fan_in, fan_out), jnp.float32, -bound, bound)
    b = jax.random.uniform(kb, (1, fan_out), jnp.float32, -bound, bound)
    return w, b


def make_params(key, image_dim, hidden_dim, latent_dim):
    keys = jax.random.split(key, 10)
    p = {}
    # encoder
    p["w1"], p["b1"] = _linear_params(keys[0], image_dim + 2, hidden_dim)
    p["w2"], p["b2"] = _linear_params(keys[1], hidden_dim, hidden_dim)
    p["w31"], p["b31"] = _linear_params(keys[2], hidden_dim, latent_dim)
    p["w32"], p["b32"] = _linear_params(keys[3], hidden_dim, latent_dim)
    # x0 decoder (fc1 takes latent_dim + 1)
    p["wd1"], p["bd1"] = _linear_params(keys[4], latent_dim + 1, hidden_dim)
    p["wd2"], p["bd2"] = _linear_params(keys[5], hidden_dim, hidden_dim)
    p["wd3"], p["bd3"] = _linear_params(keys[6], hidden_dim, hidden_dim)
    p["wd4"], p["bd4"] = _linear_params(keys[7], hidden_dim, image_dim)
    # x1 heads (module hardcodes Linear(256 + 1, 1) => latent_dim must be 256)
    p["wm"], p["bm"] = _linear_params(keys[8], 256 + 1, 1)
    p["wp"], p["bp"] = _linear_params(keys[9], 256 + 1, 1)
    return p


def _round_up(x, m):
    return (x + m - 1) // m * m


KERNEL_ARG_ORDER = [
    "w1x0", "w1x1", "w1y", "b1",
    "w2", "b2",
    "w3f", "b3f",
    "wzf", "wd1y", "bd1",
    "wd2", "bd2", "wd3", "bd3",
    "wd4p", "bd4p",
    "wmy", "bm", "wpy", "bp",
]


def prepare_kernel_params(p, image_dim, hidden_dim, latent_dim):
    """Fuse / pad PyTorch-layout params into kernel-friendly lane-dense form."""
    assert latent_dim == 256, "x1 heads hardcode Linear(256 + 1, 1)"
    slab_w = max(128, _round_up(image_dim + 2, 128))
    kp = {}
    # encoder fc1 split (x0 | x1 | y)
    kp["w1x0"] = p["w1"][:image_dim]
    kp["w1x1"] = p["w1"][image_dim:image_dim + 1]
    kp["w1y"] = p["w1"][image_dim + 1:image_dim + 2]
    kp["b1"] = p["b1"]
    kp["w2"], kp["b2"] = p["w2"], p["b2"]
    # fused encoder heads
    kp["w3f"] = jnp.concatenate([p["w31"], p["w32"]], axis=1)
    kp["b3f"] = jnp.concatenate([p["b31"], p["b32"]], axis=1)
    # fused z consumer: [decoder.fc1 z-part | x1_mu z-part | x1_logprec z-part]
    kp["wzf"] = jnp.concatenate(
        [p["wd1"][:latent_dim], p["wm"][:latent_dim], p["wp"][:latent_dim]], axis=1)
    kp["wd1y"] = p["wd1"][latent_dim:latent_dim + 1]
    kp["bd1"] = p["bd1"]
    kp["wd2"], kp["bd2"] = p["wd2"], p["bd2"]
    kp["wd3"], kp["bd3"] = p["wd3"], p["bd3"]
    # final decoder layer zero-padded to the lane-dense slab width
    kp["wd4p"] = jnp.pad(p["wd4"], ((0, 0), (0, slab_w - image_dim)))
    kp["bd4p"] = jnp.pad(p["bd4"], ((0, 0), (0, slab_w - image_dim)))
    # y-parts / biases of the x1 heads
    kp["wmy"] = p["wm"][latent_dim:latent_dim + 1]
    kp["bm"] = p["bm"]
    kp["wpy"] = p["wp"][latent_dim:latent_dim + 1]
    kp["bp"] = p["bp"]
    return kp, slab_w


def semi_supervised_vae_forward(params, x0, x1, y, eps, *, batch_tile=1024):
    B, image_dim = x0.shape
    hidden_dim = params["w2"].shape[0]
    latent_dim = params["w31"].shape[1]
    kp, slab_w = prepare_kernel_params(params, image_dim, hidden_dim, latent_dim)

    # batch grid: one "parallel" axis so Mosaic can shard steps across TCs (v7x).
    tb = B if B <= batch_tile else batch_tile
    assert B % tb == 0 and (tb == B or tb % 8 == 0), "batch must tile cleanly"
    grid = (B // tb,)

    def batched(ncols):
        return pl.BlockSpec((tb, ncols), lambda i: (i, 0))

    def resident(arr):
        return pl.BlockSpec(arr.shape, lambda i: (0, 0))

    weights = [kp[k] for k in KERNEL_ARG_ORDER]
    in_specs = ([batched(image_dim), batched(1), batched(1), batched(latent_dim)]
                + [resident(w) for w in weights])
    out_specs = (batched(2 * latent_dim), batched(slab_w))
    out_shape = (jax.ShapeDtypeStruct((B, 2 * latent_dim), jnp.float32),
                 jax.ShapeDtypeStruct((B, slab_w), jnp.float32))

    flops = 2 * B * (image_dim * hidden_dim            # enc fc1 (x0 part)
                     + hidden_dim * hidden_dim         # enc fc2
                     + hidden_dim * 2 * latent_dim     # fused mu|logvar heads
                     + latent_dim * (hidden_dim + 2)   # fused z-consumer matmul
                     + 2 * hidden_dim * hidden_dim     # dec fc2, fc3
                     + hidden_dim * slab_w)            # dec fc4 (padded)
    transcendentals = B * (5 * hidden_dim + latent_dim)   # sigmoids + exp(logvar/2)
    bytes_accessed = 4 * (x0.size + x1.size + y.size + eps.size
                          + sum(int(np.prod(w.shape)) for w in weights)
                          + B * (2 * latent_dim + slab_w))

    mulv, slab = pl.pallas_call(
        vae_kernel,
        out_shape=out_shape,
        grid=grid,
        in_specs=in_specs,
        out_specs=out_specs,
        compiler_params=pltpu.CompilerParams(
            dimension_semantics=("parallel",),
            vmem_limit_bytes=32 * 1024 * 1024),
        cost_estimate=pl.CostEstimate(
            flops=flops, transcendentals=transcendentals,
            bytes_accessed=bytes_accessed),
    )(x0, x1, y, eps, *weights)

    mu = mulv[:, :latent_dim]
    logvar = mulv[:, latent_dim:]
    x0_reconst = slab[:, :image_dim]
    x1_mu = slab[:, image_dim:image_dim + 1]
    x1_logprec = slab[:, image_dim + 1:image_dim + 2]
    return x0_reconst, x1_mu, x1_logprec, mu, logvar


def reference_forward(params, x0, x1, y, eps):
    """Pure-JAX reference mirroring the PyTorch module exactly."""
    def swish(v):
        return v * jax.nn.sigmoid(v)
    x = jnp.concatenate([x0, x1, y], axis=1)
    h = swish(x @ params["w1"] + params["b1"])
    h = swish(h @ params["w2"] + params["b2"])
    mu = h @ params["w31"] + params["b31"]
    logvar = h @ params["w32"] + params["b32"]
    z = mu + eps * jnp.exp(0.5 * logvar)
    zy = jnp.concatenate([z, y], axis=1)
    d = swish(zy @ params["wd1"] + params["bd1"])
    d = swish(d @ params["wd2"] + params["bd2"])
    d = swish(d @ params["wd3"] + params["bd3"])
    x0r = d @ params["wd4"] + params["bd4"]
    x1_mu = zy @ params["wm"] + params["bm"]
    x1_lp = zy @ params["wp"] + params["bp"]
    return x0r, x1_mu, x1_lp, mu, logvar


if __name__ == "__main__":
    # latent_dim is forced to 256 by the hardcoded Linear(256 + 1, 1) heads.
    B, image_dim, hidden_dim, latent_dim = 8, 16, 32, 256

    key = jax.random.PRNGKey(0)
    k_par, k_x0, k_x1, k_y, k_eps = jax.random.split(key, 5)

    params = make_params(k_par, image_dim, hidden_dim, latent_dim)
    x0 = jax.random.normal(k_x0, (B, image_dim), jnp.float32)
    x1 = jax.random.normal(k_x1, (B, 1), jnp.float32)
    y = jax.random.bernoulli(k_y, 0.5, (B, 1)).astype(jnp.float32)
    eps = jax.random.normal(k_eps, (B, latent_dim), jnp.float32)

    outs = semi_supervised_vae_forward(params, x0, x1, y, eps)
    outs = jax.block_until_ready(outs)

    refs = reference_forward(params, x0, x1, y, eps)
    for o, r in zip(outs, refs):
        np.testing.assert_allclose(np.asarray(o), np.asarray(r),
                                   rtol=1e-4, atol=1e-4)

    print("KERNEL_OK")
</pallas_src>

<mosaic_0001>
module attributes {stable_mosaic.version = 11 : i64} {
  func.func @vae_kernel(%arg0: i32, %arg1: memref<8x16xf32, #tpu.memory_space<vmem>>, %arg2: memref<8x1xf32, #tpu.memory_space<vmem>>, %arg3: memref<8x1xf32, #tpu.memory_space<vmem>>, %arg4: memref<8x256xf32, #tpu.memory_space<vmem>>, %arg5: memref<16x32xf32, #tpu.memory_space<vmem>>, %arg6: memref<1x32xf32, #tpu.memory_space<vmem>>, %arg7: memref<1x32xf32, #tpu.memory_space<vmem>>, %arg8: memref<1x32xf32, #tpu.memory_space<vmem>>, %arg9: memref<32x32xf32, #tpu.memory_space<vmem>>, %arg10: memref<1x32xf32, #tpu.memory_space<vmem>>, %arg11: memref<32x512xf32, #tpu.memory_space<vmem>>, %arg12: memref<1x512xf32, #tpu.memory_space<vmem>>, %arg13: memref<256x34xf32, #tpu.memory_space<vmem>>, %arg14: memref<1x32xf32, #tpu.memory_space<vmem>>, %arg15: memref<1x32xf32, #tpu.memory_space<vmem>>, %arg16: memref<32x32xf32, #tpu.memory_space<vmem>>, %arg17: memref<1x32xf32, #tpu.memory_space<vmem>>, %arg18: memref<32x32xf32, #tpu.memory_space<vmem>>, %arg19: memref<1x32xf32, #tpu.memory_space<vmem>>, %arg20: memref<32x128xf32, #tpu.memory_space<vmem>>, %arg21: memref<1x128xf32, #tpu.memory_space<vmem>>, %arg22: memref<1x1xf32, #tpu.memory_space<vmem>>, %arg23: memref<1x1xf32, #tpu.memory_space<vmem>>, %arg24: memref<1x1xf32, #tpu.memory_space<vmem>>, %arg25: memref<1x1xf32, #tpu.memory_space<vmem>>, %arg26: memref<8x512xf32, #tpu.memory_space<vmem>>, %arg27: memref<8x128xf32, #tpu.memory_space<vmem>>) attributes {dimension_semantics = [#tpu.dimension_semantics<parallel>], iteration_bounds = array<i64: 1>, scalar_prefetch = 0 : i64, scratch_operands = 0 : i64, tpu.core_type = #tpu.core_type<tc>, window_params = [{transform_indices = @transform_0, window_bounds = array<i64: 8, 16>}, {transform_indices = @transform_1, window_bounds = array<i64: 8, 1>}, {transform_indices = @transform_2, window_bounds = array<i64: 8, 1>}, {transform_indices = @transform_3, window_bounds = array<i64: 8, 256>}, {pipeline_mode = #tpu.pipeline_mode<synchronous>, transform_indices = @transform_4, window_bounds = array<i64: 16, 32>}, {pipeline_mode = #tpu.pipeline_mode<synchronous>, transform_indices = @transform_5, window_bounds = array<i64: 1, 32>}, {pipeline_mode = #tpu.pipeline_mode<synchronous>, transform_indices = @transform_6, window_bounds = array<i64: 1, 32>}, {pipeline_mode = #tpu.pipeline_mode<synchronous>, transform_indices = @transform_7, window_bounds = array<i64: 1, 32>}, {pipeline_mode = #tpu.pipeline_mode<synchronous>, transform_indices = @transform_8, window_bounds = array<i64: 32, 32>}, {pipeline_mode = #tpu.pipeline_mode<synchronous>, transform_indices = @transform_9, window_bounds = array<i64: 1, 32>}, {pipeline_mode = #tpu.pipeline_mode<synchronous>, transform_indices = @transform_10, window_bounds = array<i64: 32, 512>}, {pipeline_mode = #tpu.pipeline_mode<synchronous>, transform_indices = @transform_11, window_bounds = array<i64: 1, 512>}, {pipeline_mode = #tpu.pipeline_mode<synchronous>, transform_indices = @transform_12, window_bounds = array<i64: 256, 34>}, {pipeline_mode = #tpu.pipeline_mode<synchronous>, transform_indices = @transform_13, window_bounds = array<i64: 1, 32>}, {pipeline_mode = #tpu.pipeline_mode<synchronous>, transform_indices = @transform_14, window_bounds = array<i64: 1, 32>}, {pipeline_mode = #tpu.pipeline_mode<synchronous>, transform_indices = @transform_15, window_bounds = array<i64: 32, 32>}, {pipeline_mode = #tpu.pipeline_mode<synchronous>, transform_indices = @transform_16, window_bounds = array<i64: 1, 32>}, {pipeline_mode = #tpu.pipeline_mode<synchronous>, transform_indices = @transform_17, window_bounds = array<i64: 32, 32>}, {pipeline_mode = #tpu.pipeline_mode<synchronous>, transform_indices = @transform_18, window_bounds = array<i64: 1, 32>}, {pipeline_mode = #tpu.pipeline_mode<synchronous>, transform_indices = @transform_19, window_bounds = array<i64: 32, 128>}, {pipeline_mode = #tpu.pipeline_mode<synchronous>, transform_indices = @transform_20, window_bounds = array<i64: 1, 128>}, {pipeline_mode = #tpu.pipeline_mode<synchronous>, transform_indices = @transform_21, window_bounds = array<i64: 1, 1>}, {pipeline_mode = #tpu.pipeline_mode<synchronous>, transform_indices = @transform_22, window_bounds = array<i64: 1, 1>}, {pipeline_mode = #tpu.pipeline_mode<synchronous>, transform_indices = @transform_23, window_bounds = array<i64: 1, 1>}, {pipeline_mode = #tpu.pipeline_mode<synchronous>, transform_indices = @transform_24, window_bounds = array<i64: 1, 1>}, {transform_indices = @transform_25, window_bounds = array<i64: 8, 512>}, {transform_indices = @transform_26, window_bounds = array<i64: 8, 128>}]} {
    %c0 = arith.constant 0 : index
    %c0_0 = arith.constant 0 : index
    %0 = vector.load %arg1[%c0, %c0_0] : memref<8x16xf32, #tpu.memory_space<vmem>>, vector<8x16xf32>
    %c0_1 = arith.constant 0 : index
    %c0_2 = arith.constant 0 : index
    %1 = vector.load %arg2[%c0_1, %c0_2] : memref<8x1xf32, #tpu.memory_space<vmem>>, vector<8x1xf32>
    %c0_3 = arith.constant 0 : index
    %c0_4 = arith.constant 0 : index
    %2 = vector.load %arg3[%c0_3, %c0_4] : memref<8x1xf32, #tpu.memory_space<vmem>>, vector<8x1xf32>
    %c0_5 = arith.constant 0 : index
    %c0_6 = arith.constant 0 : index
    %3 = vector.load %arg5[%c0_5, %c0_6] : memref<16x32xf32, #tpu.memory_space<vmem>>, vector<16x32xf32>
    %cst = arith.constant dense<0.000000e+00> : vector<8x32xf32>
    %4 = tpu.matmul %0, %3, %cst {dimension_numbers = #tpu.dot_dimension_numbers<[1], [0], [0], [1], [0, 0, 1, 1], [], []>} : vector<8x16xf32>, vector<16x32xf32>, vector<8x32xf32> -> vector<8x32xf32>
    %c0_7 = arith.constant 0 : index
    %c0_8 = arith.constant 0 : index
    %5 = vector.load %arg6[%c0_7, %c0_8] : memref<1x32xf32, #tpu.memory_space<vmem>>, vector<1x32xf32>
    %6 = vector.broadcast %1 : vector<8x1xf32> to vector<8x32xf32>
    %7 = vector.broadcast %5 : vector<1x32xf32> to vector<8x32xf32>
    %8 = arith.mulf %6, %7 : vector<8x32xf32>
    %9 = arith.addf %4, %8 : vector<8x32xf32>
    %c0_9 = arith.constant 0 : index
    %c0_10 = arith.constant 0 : index
    %10 = vector.load %arg7[%c0_9, %c0_10] : memref<1x32xf32, #tpu.memory_space<vmem>>, vector<1x32xf32>
    %11 = vector.broadcast %2 : vector<8x1xf32> to vector<8x32xf32>
    %12 = vector.broadcast %10 : vector<1x32xf32> to vector<8x32xf32>
    %13 = arith.mulf %11, %12 : vector<8x32xf32>
    %14 = arith.addf %9, %13 : vector<8x32xf32>
    %c0_11 = arith.constant 0 : index
    %c0_12 = arith.constant 0 : index
    %15 = vector.load %arg8[%c0_11, %c0_12] : memref<1x32xf32, #tpu.memory_space<vmem>>, vector<1x32xf32>
    %16 = vector.broadcast %15 : vector<1x32xf32> to vector<8x32xf32>
    %17 = arith.addf %14, %16 : vector<8x32xf32>
    %18 = arith.negf %17 : vector<8x32xf32>
    %19 = math.exp %18 : vector<8x32xf32>
    %cst_13 = arith.constant 1.000000e+00 : f32
    %20 = vector.broadcast %cst_13 : f32 to vector<8x32xf32>
    %21 = arith.addf %20, %19 : vector<8x32xf32>
    %22 = arith.divf %20, %21 : vector<8x32xf32>
    %23 = arith.mulf %17, %22 : vector<8x32xf32>
    %c0_14 = arith.constant 0 : index
    %c0_15 = arith.constant 0 : index
    %24 = vector.load %arg9[%c0_14, %c0_15] : memref<32x32xf32, #tpu.memory_space<vmem>>, vector<32x32xf32>
    %cst_16 = arith.constant dense<0.000000e+00> : vector<8x32xf32>
    %25 = tpu.matmul %23, %24, %cst_16 {dimension_numbers = #tpu.dot_dimension_numbers<[1], [0], [0], [1], [0, 0, 1, 1], [], []>} : vector<8x32xf32>, vector<32x32xf32>, vector<8x32xf32> -> vector<8x32xf32>
    %c0_17 = arith.constant 0 : index
    %c0_18 = arith.constant 0 : index
    %26 = vector.load %arg10[%c0_17, %c0_18] : memref<1x32xf32, #tpu.memory_space<vmem>>, vector<1x32xf32>
    %27 = vector.broadcast %26 : vector<1x32xf32> to vector<8x32xf32>
    %28 = arith.addf %25, %27 : vector<8x32xf32>
    %29 = arith.negf %28 : vector<8x32xf32>
    %30 = math.exp %29 : vector<8x32xf32>
    %cst_19 = arith.constant 1.000000e+00 : f32
    %31 = vector.broadcast %cst_19 : f32 to vector<8x32xf32>
    %32 = arith.addf %31, %30 : vector<8x32xf32>
    %33 = arith.divf %31, %32 : vector<8x32xf32>
    %34 = arith.mulf %28, %33 : vector<8x32xf32>
    %c0_20 = arith.constant 0 : index
    %c0_21 = arith.constant 0 : index
    %35 = vector.load %arg11[%c0_20, %c0_21] : memref<32x512xf32, #tpu.memory_space<vmem>>, vector<32x512xf32>
    %cst_22 = arith.constant dense<0.000000e+00> : vector<8x512xf32>
    %36 = tpu.matmul %34, %35, %cst_22 {dimension_numbers = #tpu.dot_dimension_numbers<[1], [0], [0], [1], [0, 0, 1, 1], [], []>} : vector<8x32xf32>, vector<32x512xf32>, vector<8x512xf32> -> vector<8x512xf32>
    %c0_23 = arith.constant 0 : index
    %c0_24 = arith.constant 0 : index
    %37 = vector.load %arg12[%c0_23, %c0_24] : memref<1x512xf32, #tpu.memory_space<vmem>>, vector<1x512xf32>
    %38 = vector.broadcast %37 : vector<1x512xf32> to vector<8x512xf32>
    %39 = arith.addf %36, %38 : vector<8x512xf32>
    %c0_25 = arith.constant 0 : index
    %c0_26 = arith.constant 0 : index
    %40 = vector.load %arg26[%c0_25, %c0_26] : memref<8x512xf32, #tpu.memory_space<vmem>>, vector<8x512xf32>
    tpu.vector_store %arg26[%c0_25, %c0_26], %39 {strides = array<i32>} : memref<8x512xf32, #tpu.memory_space<vmem>>, vector<8x512xf32>,
    %41 = vector.extract_strided_slice %39 {offsets = [0, 0], sizes = [8, 256], strides = [1, 1]} : vector<8x512xf32> to vector<8x256xf32>
    %42 = vector.extract_strided_slice %39 {offsets = [0, 256], sizes = [8, 256], strides = [1, 1]} : vector<8x512xf32> to vector<8x256xf32>
    %c0_27 = arith.constant 0 : index
    %c0_28 = arith.constant 0 : index
    %43 = vector.load %arg4[%c0_27, %c0_28] : memref<8x256xf32, #tpu.memory_space<vmem>>, vector<8x256xf32>
    %cst_29 = arith.constant 5.000000e-01 : f32
    %44 = vector.broadcast %cst_29 : f32 to vector<8x256xf32>
    %45 = arith.mulf %44, %42 : vector<8x256xf32>
    %46 = math.exp %45 : vector<8x256xf32>
    %47 = arith.mulf %43, %46 : vector<8x256xf32>
    %48 = arith.addf %41, %47 : vector<8x256xf32>
    %c0_30 = arith.constant 0 : index
    %c0_31 = arith.constant 0 : index
    %49 = vector.load %arg13[%c0_30, %c0_31] : memref<256x34xf32, #tpu.memory_space<vmem>>, vector<256x34xf32>
    %cst_32 = arith.constant dense<0.000000e+00> : vector<8x34xf32>
    %50 = tpu.matmul %48, %49, %cst_32 {dimension_numbers = #tpu.dot_dimension_numbers<[1], [0], [0], [1], [0, 0, 1, 1], [], []>} : vector<8x256xf32>, vector<256x34xf32>, vector<8x34xf32> -> vector<8x34xf32>
    %51 = vector.extract_strided_slice %50 {offsets = [0, 0], sizes = [8, 32], strides = [1, 1]} : vector<8x34xf32> to vector<8x32xf32>
    %c0_33 = arith.constant 0 : index
    %c0_34 = arith.constant 0 : index
    %52 = vector.load %arg14[%c0_33, %c0_34] : memref<1x32xf32, #tpu.memory_space<vmem>>, vector<1x32xf32>
    %53 = vector.broadcast %2 : vector<8x1xf32> to vector<8x32xf32>
    %54 = vector.broadcast %52 : vector<1x32xf32> to vector<8x32xf32>
    %55 = arith.mulf %53, %54 : vector<8x32xf32>
    %56 = arith.addf %51, %55 : vector<8x32xf32>
    %c0_35 = arith.constant 0 : index
    %c0_36 = arith.constant 0 : index
    %57 = vector.load %arg15[%c0_35, %c0_36] : memref<1x32xf32, #tpu.memory_space<vmem>>, vector<1x32xf32>
    %58 = vector.broadcast %57 : vector<1x32xf32> to vector<8x32xf32>
    %59 = arith.addf %56, %58 : vector<8x32xf32>
    %60 = arith.negf %59 : vector<8x32xf32>
    %61 = math.exp %60 : vector<8x32xf32>
    %cst_37 = arith.constant 1.000000e+00 : f32
    %62 = vector.broadcast %cst_37 : f32 to vector<8x32xf32>
    %63 = arith.addf %62, %61 : vector<8x32xf32>
    %64 = arith.divf %62, %63 : vector<8x32xf32>
    %65 = arith.mulf %59, %64 : vector<8x32xf32>
    %66 = vector.extract_strided_slice %50 {offsets = [0, 32], sizes = [8, 1], strides = [1, 1]} : vector<8x34xf32> to vector<8x1xf32>
    %c0_38 = arith.constant 0 : index
    %c0_39 = arith.constant 0 : index
    %67 = vector.load %arg22[%c0_38, %c0_39] : memref<1x1xf32, #tpu.memory_space<vmem>>, vector<1x1xf32>
    %68 = vector.broadcast %67 : vector<1x1xf32> to vector<8x1xf32>
    %69 = arith.mulf %2, %68 : vector<8x1xf32>
    %70 = arith.addf %66, %69 : vector<8x1xf32>
    %c0_40 = arith.constant 0 : index
    %c0_41 = arith.constant 0 : index
    %71 = vector.load %arg23[%c0_40, %c0_41] : memref<1x1xf32, #tpu.memory_space<vmem>>, vector<1x1xf32>
    %72 = vector.broadcast %71 : vector<1x1xf32> to vector<8x1xf32>
    %73 = arith.addf %70, %72 : vector<8x1xf32>
    %74 = vector.extract_strided_slice %50 {offsets = [0, 33], sizes = [8, 1], strides = [1, 1]} : vector<8x34xf32> to vector<8x1xf32>
    %c0_42 = arith.constant 0 : index
    %c0_43 = arith.constant 0 : index
    %75 = vector.load %arg24[%c0_42, %c0_43] : memref<1x1xf32, #tpu.memory_space<vmem>>, vector<1x1xf32>
    %76 = vector.broadcast %75 : vector<1x1xf32> to vector<8x1xf32>
    %77 = arith.mulf %2, %76 : vector<8x1xf32>
    %78 = arith.addf %74, %77 : vector<8x1xf32>
    %c0_44 = arith.constant 0 : index
    %c0_45 = arith.constant 0 : index
    %79 = vector.load %arg25[%c0_44, %c0_45] : memref<1x1xf32, #tpu.memory_space<vmem>>, vector<1x1xf32>
    %80 = vector.broadcast %79 : vector<1x1xf32> to vector<8x1xf32>
    %81 = arith.addf %78, %80 : vector<8x1xf32>
    %c0_46 = arith.constant 0 : index
    %c0_47 = arith.constant 0 : index
    %82 = vector.load %arg16[%c0_46, %c0_47] : memref<32x32xf32, #tpu.memory_space<vmem>>, vector<32x32xf32>
    %cst_48 = arith.constant dense<0.000000e+00> : vector<8x32xf32>
    %83 = tpu.matmul %65, %82, %cst_48 {dimension_numbers = #tpu.dot_dimension_numbers<[1], [0], [0], [1], [0, 0, 1, 1], [], []>} : vector<8x32xf32>, vector<32x32xf32>, vector<8x32xf32> -> vector<8x32xf32>
    %c0_49 = arith.constant 0 : index
    %c0_50 = arith.constant 0 : index
    %84 = vector.load %arg17[%c0_49, %c0_50] : memref<1x32xf32, #tpu.memory_space<vmem>>, vector<1x32xf32>
    %85 = vector.broadcast %84 : vector<1x32xf32> to vector<8x32xf32>
    %86 = arith.addf %83, %85 : vector<8x32xf32>
    %87 = arith.negf %86 : vector<8x32xf32>
    %88 = math.exp %87 : vector<8x32xf32>
    %cst_51 = arith.constant 1.000000e+00 : f32
    %89 = vector.broadcast %cst_51 : f32 to vector<8x32xf32>
    %90 = arith.addf %89, %88 : vector<8x32xf32>
    %91 = arith.divf %89, %90 : vector<8x32xf32>
    %92 = arith.mulf %86, %91 : vector<8x32xf32>
    %c0_52 = arith.constant 0 : index
    %c0_53 = arith.constant 0 : index
    %93 = vector.load %arg18[%c0_52, %c0_53] : memref<32x32xf32, #tpu.memory_space<vmem>>, vector<32x32xf32>
    %cst_54 = arith.constant dense<0.000000e+00> : vector<8x32xf32>
    %94 = tpu.matmul %92, %93, %cst_54 {dimension_numbers = #tpu.dot_dimension_numbers<[1], [0], [0], [1], [0, 0, 1, 1], [], []>} : vector<8x32xf32>, vector<32x32xf32>, vector<8x32xf32> -> vector<8x32xf32>
    %c0_55 = arith.constant 0 : index
    %c0_56 = arith.constant 0 : index
    %95 = vector.load %arg19[%c0_55, %c0_56] : memref<1x32xf32, #tpu.memory_space<vmem>>, vector<1x32xf32>
    %96 = vector.broadcast %95 : vector<1x32xf32> to vector<8x32xf32>
    %97 = arith.addf %94, %96 : vector<8x32xf32>
    %98 = arith.negf %97 : vector<8x32xf32>
    %99 = math.exp %98 : vector<8x32xf32>
    %cst_57 = arith.constant 1.000000e+00 : f32
    %100 = vector.broadcast %cst_57 : f32 to vector<8x32xf32>
    %101 = arith.addf %100, %99 : vector<8x32xf32>
    %102 = arith.divf %100, %101 : vector<8x32xf32>
    %103 = arith.mulf %97, %102 : vector<8x32xf32>
    %c0_58 = arith.constant 0 : index
    %c0_59 = arith.constant 0 : index
    %104 = vector.load %arg20[%c0_58, %c0_59] : memref<32x128xf32, #tpu.memory_space<vmem>>, vector<32x128xf32>
    %cst_60 = arith.constant dense<0.000000e+00> : vector<8x128xf32>
    %105 = tpu.matmul %103, %104, %cst_60 {dimension_numbers = #tpu.dot_dimension_numbers<[1], [0], [0], [1], [0, 0, 1, 1], [], []>} : vector<8x32xf32>, vector<32x128xf32>, vector<8x128xf32> -> vector<8x128xf32>
    %c0_61 = arith.constant 0 : index
    %c0_62 = arith.constant 0 : index
    %106 = vector.load %arg21[%c0_61, %c0_62] : memref<1x128xf32, #tpu.memory_space<vmem>>, vector<1x128xf32>
    %107 = vector.broadcast %106 : vector<1x128xf32> to vector<8x128xf32>
    %108 = arith.addf %105, %107 : vector<8x128xf32>
    %109 = tpu.iota {dimensions = array<i32: 1>} : vector<8x128xi32>
    %c16_i32 = arith.constant 16 : i32
    %110 = vector.broadcast %c16_i32 : i32 to vector<8x128xi32>
    %111 = arith.cmpi eq, %109, %110 : vector<8x128xi32>
    %112 = vector.shape_cast %73 : vector<8x1xf32> to vector<8x1xf32>
    %113 = vector.broadcast %112 : vector<8x1xf32> to vector<8x128xf32>
    %114 = arith.select %111, %113, %108 : vector<8x128xi1>, vector<8x128xf32>
    %c17_i32 = arith.constant 17 : i32
    %115 = vector.broadcast %c17_i32 : i32 to vector<8x128xi32>
    %116 = arith.cmpi eq, %109, %115 : vector<8x128xi32>
    %117 = vector.shape_cast %81 : vector<8x1xf32> to vector<8x1xf32>
    %118 = vector.broadcast %117 : vector<8x1xf32> to vector<8x128xf32>
    %119 = arith.select %116, %118, %114 : vector<8x128xi1>, vector<8x128xf32>
    %c0_63 = arith.constant 0 : index
    %c0_64 = arith.constant 0 : index
    %120 = vector.load %arg27[%c0_63, %c0_64] : memref<8x128xf32, #tpu.memory_space<vmem>>, vector<8x128xf32>
    tpu.vector_store %arg27[%c0_63, %c0_64], %119 {strides = array<i32>} : memref<8x128xf32, #tpu.memory_space<vmem>>, vector<8x128xf32>,
    return
  }
  func.func @transform_0(%arg0: i32) -> (i32, i32) {
    %c0_i32 = arith.constant 0 : i32
    %c0_i32_0 = arith.constant 0 : i32
    return %arg0, %c0_i32 : i32, i32
  }
  func.func @transform_1(%arg0: i32) -> (i32, i32) {
    %c0_i32 = arith.constant 0 : i32
    %c0_i32_0 = arith.constant 0 : i32
    return %arg0, %c0_i32 : i32, i32
  }
  func.func @transform_2(%arg0: i32) -> (i32, i32) {
    %c0_i32 = arith.constant 0 : i32
    %c0_i32_0 = arith.constant 0 : i32
    return %arg0, %c0_i32 : i32, i32
  }
  func.func @transform_3(%arg0: i32) -> (i32, i32) {
    %c0_i32 = arith.constant 0 : i32
    %c0_i32_0 = arith.constant 0 : i32
    return %arg0, %c0_i32 : i32, i32
  }
  func.func @transform_4(%arg0: i32) -> (i32, i32) {
    %c0_i32 = arith.constant 0 : i32
    %c0_i32_0 = arith.constant 0 : i32
    %c0_i32_1 = arith.constant 0 : i32
    return %c0_i32, %c0_i32_0 : i32, i32
  }
  func.func @transform_5(%arg0: i32) -> (i32, i32) {
    %c0_i32 = arith.constant 0 : i32
    %c0_i32_0 = arith.constant 0 : i32
    %c0_i32_1 = arith.constant 0 : i32
    return %c0_i32, %c0_i32_0 : i32, i32
  }
  func.func @transform_6(%arg0: i32) -> (i32, i32) {
    %c0_i32 = arith.constant 0 : i32
    %c0_i32_0 = arith.constant 0 : i32
    %c0_i32_1 = arith.constant 0 : i32
    return %c0_i32, %c0_i32_0 : i32, i32
  }
  func.func @transform_7(%arg0: i32) -> (i32, i32) {
    %c0_i32 = arith.constant 0 : i32
    %c0_i32_0 = arith.constant 0 : i32
    %c0_i32_1 = arith.constant 0 : i32
    return %c0_i32, %c0_i32_0 : i32, i32
  }
  func.func @transform_8(%arg0: i32) -> (i32, i32) {
    %c0_i32 = arith.constant 0 : i32
    %c0_i32_0 = arith.constant 0 : i32
    %c0_i32_1 = arith.constant 0 : i32
    return %c0_i32, %c0_i32_0 : i32, i32
  }
  func.func @transform_9(%arg0: i32) -> (i32, i32) {
    %c0_i32 = arith.constant 0 : i32
    %c0_i32_0 = arith.constant 0 : i32
    %c0_i32_1 = arith.constant 0 : i32
    return %c0_i32, %c0_i32_0 : i32, i32
  }
  func.func @transform_10(%arg0: i32) -> (i32, i32) {
    %c0_i32 = arith.constant 0 : i32
    %c0_i32_0 = arith.constant 0 : i32
    %c0_i32_1 = arith.constant 0 : i32
    return %c0_i32, %c0_i32_0 : i32, i32
  }
  func.func @transform_11(%arg0: i32) -> (i32, i32) {
    %c0_i32 = arith.constant 0 : i32
    %c0_i32_0 = arith.constant 0 : i32
    %c0_i32_1 = arith.constant 0 : i32
    return %c0_i32, %c0_i32_0 : i32, i32
  }
  func.func @transform_12(%arg0: i32) -> (i32, i32) {
    %c0_i32 = arith.constant 0 : i32
    %c0_i32_0 = arith.constant 0 : i32
    %c0_i32_1 = arith.constant 0 : i32
    return %c0_i32, %c0_i32_0 : i32, i32
  }
  func.func @transform_13(%arg0: i32) -> (i32, i32) {
    %c0_i32 = arith.constant 0 : i32
    %c0_i32_0 = arith.constant 0 : i32
    %c0_i32_1 = arith.constant 0 : i32
    return %c0_i32, %c0_i32_0 : i32, i32
  }
  func.func @transform_14(%arg0: i32) -> (i32, i32) {
    %c0_i32 = arith.constant 0 : i32
    %c0_i32_0 = arith.constant 0 : i32
    %c0_i32_1 = arith.constant 0 : i32
    return %c0_i32, %c0_i32_0 : i32, i32
  }
  func.func @transform_15(%arg0: i32) -> (i32, i32) {
    %c0_i32 = arith.constant 0 : i32
    %c0_i32_0 = arith.constant 0 : i32
    %c0_i32_1 = arith.constant 0 : i32
    return %c0_i32, %c0_i32_0 : i32, i32
  }
  func.func @transform_16(%arg0: i32) -> (i32, i32) {
    %c0_i32 = arith.constant 0 : i32
    %c0_i32_0 = arith.constant 0 : i32
    %c0_i32_1 = arith.constant 0 : i32
    return %c0_i32, %c0_i32_0 : i32, i32
  }
  func.func @transform_17(%arg0: i32) -> (i32, i32) {
    %c0_i32 = arith.constant 0 : i32
    %c0_i32_0 = arith.constant 0 : i32
    %c0_i32_1 = arith.constant 0 : i32
    return %c0_i32, %c0_i32_0 : i32, i32
  }
  func.func @transform_18(%arg0: i32) -> (i32, i32) {
    %c0_i32 = arith.constant 0 : i32
    %c0_i32_0 = arith.constant 0 : i32
    %c0_i32_1 = arith.constant 0 : i32
    return %c0_i32, %c0_i32_0 : i32, i32
  }
  func.func @transform_19(%arg0: i32) -> (i32, i32) {
    %c0_i32 = arith.constant 0 : i32
    %c0_i32_0 = arith.constant 0 : i32
    %c0_i32_1 = arith.constant 0 : i32
    return %c0_i32, %c0_i32_0 : i32, i32
  }
  func.func @transform_20(%arg0: i32) -> (i32, i32) {
    %c0_i32 = arith.constant 0 : i32
    %c0_i32_0 = arith.constant 0 : i32
    %c0_i32_1 = arith.constant 0 : i32
    return %c0_i32, %c0_i32_0 : i32, i32
  }
  func.func @transform_21(%arg0: i32) -> (i32, i32) {
    %c0_i32 = arith.constant 0 : i32
    %c0_i32_0 = arith.constant 0 : i32
    %c0_i32_1 = arith.constant 0 : i32
    return %c0_i32, %c0_i32_0 : i32, i32
  }
  func.func @transform_22(%arg0: i32) -> (i32, i32) {
    %c0_i32 = arith.constant 0 : i32
    %c0_i32_0 = arith.constant 0 : i32
    %c0_i32_1 = arith.constant 0 : i32
    return %c0_i32, %c0_i32_0 : i32, i32
  }
  func.func @transform_23(%arg0: i32) -> (i32, i32) {
    %c0_i32 = arith.constant 0 : i32
    %c0_i32_0 = arith.constant 0 : i32
    %c0_i32_1 = arith.constant 0 : i32
    return %c0_i32, %c0_i32_0 : i32, i32
  }
  func.func @transform_24(%arg0: i32) -> (i32, i32) {
    %c0_i32 = arith.constant 0 : i32
    %c0_i32_0 = arith.constant 0 : i32
    %c0_i32_1 = arith.constant 0 : i32
    return %c0_i32, %c0_i32_0 : i32, i32
  }
  func.func @transform_25(%arg0: i32) -> (i32, i32) {
    %c0_i32 = arith.constant 0 : i32
    %c0_i32_0 = arith.constant 0 : i32
    return %arg0, %c0_i32 : i32, i32
  }
  func.func @transform_26(%arg0: i32) -> (i32, i32) {
    %c0_i32 = arith.constant 0 : i32
    %c0_i32_0 = arith.constant 0 : i32
    return %arg0, %c0_i32 : i32, i32
  }
}

</mosaic_0001>

<bundles_post_ra>
// kernel: tpu_custom_call.1
= control target key start
LH: loop header
LB: loop body
LE: loop exit
PB: predicated region body
PF: predicated region fallthrough
CT: control target
= control target key end

     0   :  { %s1654_s0 = inlined_call_operand.vmem [shape: f32[8,16], index: 0, kind: input, shape index: {}]   ;;  %s1655_s1 = inlined_call_operand.vmem [shape: f32[8,1], index: 1, kind: input, shape index: {}]   ;;  %s1656_s2 = inlined_call_operand.vmem [shape: f32[8,1], index: 2, kind: input, shape index: {}]   ;;  %s1657_s3 = inlined_call_operand.vmem [shape: f32[8,256], index: 3, kind: input, shape index: {}]   ;;  %s1658_s4 = inlined_call_operand.vmem [shape: f32[16,32], index: 4, kind: input, shape index: {}]   ;;  %s1659_s5 = inlined_call_operand.vmem [shape: f32[1,32], index: 5, kind: input, shape index: {}]   ;;  %s1660_s6 = inlined_call_operand.vmem [shape: f32[1,32], index: 6, kind: input, shape index: {}]   ;;  %s1661_s7 = inlined_call_operand.vmem [shape: f32[1,32], index: 7, kind: input, shape index: {}]   ;;  %s1662_s8 = inlined_call_operand.vmem [shape: f32[32,32], index: 8, kind: input, shape index: {}]   ;;  %s1663_s9 = inlined_call_operand.vmem [shape: f32[1,32], index: 9, kind: input, shape index: {}]   ;;  %s1664_s10 = inlined_call_operand.vmem [shape: f32[32,512], index: 10, kind: input, shape index: {}]   ;;  %s1665_s11 = inlined_call_operand.vmem [shape: f32[1,512], index: 11, kind: input, shape index: {}]   ;;  %s1666_s12 = inlined_call_operand.vmem [shape: f32[256,34], index: 12, kind: input, shape index: {}]   ;;  %s1667_s13 = inlined_call_operand.vmem [shape: f32[1,32], index: 13, kind: input, shape index: {}]   ;;  %s1668_s14 = inlined_call_operand.vmem [shape: f32[1,32], index: 14, kind: input, shape index: {}]   ;;  %s1669_s15 = inlined_call_operand.vmem [shape: f32[32,32], index: 15, kind: input, shape index: {}]   ;;  %s1670_s16 = inlined_call_operand.vmem [shape: f32[1,32], index: 16, kind: input, shape index: {}]   ;;  %s1671_s17 = inlined_call_operand.vmem [shape: f32[32,32], index: 17, kind: input, shape index: {}]   ;;  %s1672_s18 = inlined_call_operand.vmem [shape: f32[1,32], index: 18, kind: input, shape index: {}]   ;;  %s1673_s19 = inlined_call_operand.vmem [shape: f32[32,128], index: 19, kind: input, shape index: {}]   ;;  %s1674_s20 = inlined_call_operand.vmem [shape: f32[1,128], index: 20, kind: input, shape index: {}]   ;;  %s1675_s21 = inlined_call_operand.<no memory space> [shape: f32[1,1], index: 21, kind: input, shape index: {}]   ;;  %s1676_s25 = inlined_call_operand.hbm [shape: f32[8,512], index: 25, kind: output, shape index: {0}]   ;;  %s1677_s26 = inlined_call_operand.hbm [shape: f32[8,128], index: 26, kind: output, shape index: {1}]   ;;  %s1678_s22 = inlined_call_operand.<no memory space> [shape: f32[1,1], index: 22, kind: input, shape index: {}]   ;;  %s1679_s23 = inlined_call_operand.<no memory space> [shape: f32[1,1], index: 23, kind: input, shape index: {}]   ;;  %s1680_s24 = inlined_call_operand.<no memory space> [shape: f32[1,1], index: 24, kind: input, shape index: {}]  }
   0x1   :  { %1685 = sst [smem:[#allocation12_spill]] %s1654_s0  ;;  %v32_v0 = vstv %s1675_s21  ;;  %v34_v1 = vstv %s1678_s22  ;;  %v36_v2 = vstv %s1679_s23  ;;  %v38_v3 = vstv %s1680_s24 }
   0x2   :  { %1686 = sst [smem:[#allocation13_spill]] %s1655_s1  ;;  %33 = vst [vmem:[#allocation2] sm:$0x1] %v32_v0  ;;  %35 = vst [vmem:[#allocation3] sm:$0x1] %v34_v1 }
   0x3   :  { %1687 = sst [smem:[#allocation14_spill]] %s1656_s2  ;;  %37 = vst [vmem:[#allocation4] sm:$0x1] %v36_v2  ;;  %39 = vst [vmem:[#allocation5] sm:$0x1] %v38_v3 }
   0x4   :  { %1688 = sst [smem:[#allocation15_spill]] %s1657_s3 }
   0x5   :  { %1689 = sst [smem:[#allocation16_spill]] %s1658_s4 }
   0x6   :  { %1690 = sst [smem:[#allocation17_spill]] %s1659_s5 }
   0x7   :  { %1691 = sst [smem:[#allocation18_spill]] %s1660_s6 }
   0x8   :  { %1692 = sst [smem:[#allocation19_spill]] %s1661_s7 }
   0x9   :  { %1693 = sst [smem:[#allocation20_spill]] %s1662_s8 }
   0xa   :  { %1694 = sst [smem:[#allocation21_spill]] %s1663_s9 }
   0xb   :  { %1695 = sst [smem:[#allocation22_spill]] %s1664_s10 }
   0xc   :  { %40 = vsyncpa [#allocation7], 0  ;;  %s1696_s21 = sld [smem:[#allocation16_spill]]  ;;  %v1202_v5 = vmov 0.0   ;;  %vm1203_vm0 = vmmov 0   ;;  %vm110_vm1 = vcmask 130048  }
   0xd   :  { %1070 = vmatprep.subr.mxu0 %v1202_v5  ;;  %1074 = vmatprep.mubr.msk.f32.mxu0 %vm1203_vm0, %v1202_v5  ;;  %s1697_s5 = sld [smem:[#allocation13_spill]]  ;;  %v1204_v9 = vmov 0  }
   0xe   :  { %s1698_s1 = sld [smem:[#allocation12_spill]]  ;;  %1130 = vset.pattern.permute.xlu0 %v1204_v9 }
  0x12   :  { %v96_v4 = vld [vmem:[%s1696_s21 + $0x8] sm:$0xff]  ;;  %v95_v6 = vld [vmem:[%s1696_s21] sm:$0xff] }
  0x13   :  { %v93_v7 = vld [vmem:[%s1697_s5] sm:$0xff]  ;;  %1071 = vmatpush3.msra.mxu0 %v96_v4 }
  0x14   :  { %v92_v8 = vld [vmem:[%s1698_s1] sm:$0xff] }
  0x15   :  { %41 = vsyncpa [#allocation9], 0  ;;  %1072 = vmatprep.subr.mxu0 %v1202_v5  ;;  %100 = vperm.xlu0 %1130, %v93_v7   ;;  %s1699_s7 = sld [smem:[#allocation14_spill]]  ;;  %vm224_vm2 = vcmask 261120   ;;  %v535_v48 = vld [vmem:[%s1666_s12 + $0xf8] sm:$0xff]  ;;  %v534_v59 = vld [vmem:[%s1666_s12 + $0xf0] sm:$0xff] }
  0x16   :  { %1073 = vmatpush3.msra.mxu0 %v95_v6  ;;  %1077 = vmatprep.subr.mxu1 %v1202_v5  ;;  %s1700_s4 = sld [smem:[#allocation20_spill]]  ;;  %v519_v58 = vld [vmem:[%s1666_s12 + $0x78] sm:$0xff]  ;;  %v518_v60 = vld [vmem:[%s1666_s12 + $0x70] sm:$0xff]  ;;  %v533_v61 = vld [vmem:[%s1666_s12 + $0xe8] sm:$0xff]  ;;  %s1205_s9 = smov 32  }
  0x17   :  { %1075 = vmatmul.mubr.msk.f32.vlgmr.msra.gmra.mxu0 %vm110_vm1, %v92_v8  ;;  %1085 = vmatprep.mubr.msk.f32.mxu1 %vm1203_vm0, %v1202_v5  ;;  %s1701_s24 = sld [smem:[#allocation17_spill]]  ;;  %v517_v62 = vld [vmem:[%s1666_s12 + $0x68] sm:$0xff]  ;;  %v532_v63 = vld [vmem:[%s1666_s12 + $0xe0] sm:$0xff]  ;;  %v531_v1 = vld [vmem:[%s1666_s12 + $0xd8] sm:$0xff]  ;;  %s1206_s30 = smov 33  }
  0x18   :  { %410 = vmatprep.mubr.f32.mxu0 %v1202_v5  ;;  %s1702_s6 = sld [smem:[#allocation18_spill]]  ;;  %v516_v0 = vld [vmem:[%s1666_s12 + $0x60] sm:$0xff]  ;;  %v515_v2 = vld [vmem:[%s1666_s12 + $0x58] sm:$0xff]  ;;  %v530_v3 = vld [vmem:[%s1666_s12 + $0xd0] sm:$0xff] }
  0x19   :  { %s1703_s3 = sld [smem:[#allocation19_spill]]  ;;  %v514_v4 = vld [vmem:[%s1666_s12 + $0x50] sm:$0xff]  ;;  %v529_v6 = vld [vmem:[%s1666_s12 + $0xc8] sm:$0xff]  ;;  %v528_v8 = vld [vmem:[%s1666_s12 + $0xc0] sm:$0xff] }
  0x1a   :  { %s1704_s8 = sld [smem:[#allocation22_spill]]  ;;  %v513_v7 = vld [vmem:[%s1666_s12 + $0x48] sm:$0xff]  ;;  %v512_v9 = vld [vmem:[%s1666_s12 + $0x40] sm:$0xff] }
  0x1b   :  { %v1377_v10 = vld [vmem:[%s1699_s7] sm:$0xff]  ;;  %s1705_s7 = sld [smem:[#allocation21_spill]] }
  0x1c   :  { %187 = vperm.xlu0 %1130, %v1377_v10   ;;  %v216_v11 = vld [vmem:[%s1700_s4 + $0x18] sm:$0xff]  ;;  %v215_v12 = vld [vmem:[%s1700_s4 + $0x10] sm:$0xff]  ;;  %v214_v13 = vld [vmem:[%s1700_s4 + $0x8] sm:$0xff]  ;;  %s1706_s2 = sld [smem:[#allocation15_spill]] }
  0x1d   :  { %1078 = vmatpush3.msra.mxu1 %v216_v11  ;;  %v213_v14 = vld [vmem:[%s1700_s4] sm:$0xff]  ;;  %v527_v11 = vld [vmem:[%s1666_s12 + $0xb8] sm:$0xff] }
  0x1e   :  { %1079 = vmatprep.subr.mxu1 %v1202_v5  ;;  %v987_v16 = vld [vmem:[%s1701_s24] ss:$0 sm:$0xff] }
  0x1f   :  { %1080 = vmatpush3.msra.mxu1 %v215_v12  ;;  %v989_v17 = vld [vmem:[%s1702_s6] ss:$0 sm:$0xff]  ;;  %v511_v12 = vld [vmem:[%s1666_s12 + $0x38] sm:$0xff] }
  0x20   :  { %1081 = vmatprep.subr.mxu1 %v1202_v5  ;;  %v990_v23 = vld [vmem:[%s1703_s3] ss:$0 sm:$0xff]  ;;  %v318_v32 = vld [vmem:[%s1704_s8 + $0x68] sm:$0xff]  ;;  %v320_v33 = vld [vmem:[%s1704_s8 + $0x78] sm:$0xff] }
  0x21   :  { %1082 = vmatpush3.msra.mxu1 %v214_v13  ;;  %370 = vmatprep.subr.mxu0 %v318_v32  ;;  %v317_v34 = vld [vmem:[%s1704_s8 + $0x60] sm:$0xff]  ;;  %v319_v35 = vld [vmem:[%s1704_s8 + $0x70] sm:$0xff]  ;;  %v314_v36 = vld [vmem:[%s1704_s8 + $0x48] sm:$0xff] }
  0x22   :  { %1083 = vmatprep.subr.mxu1 %v1202_v5  ;;  %371 = vmatpush1.msra.mxu0 %v317_v34  ;;  %v316_v37 = vld [vmem:[%s1704_s8 + $0x58] sm:$0xff]  ;;  %v313_v38 = vld [vmem:[%s1704_s8 + $0x40] sm:$0xff]  ;;  %v315_v39 = vld [vmem:[%s1704_s8 + $0x50] sm:$0xff]  ;;  %v323_v34 = vlaneseq }
  0x23   :  { %1084 = vmatpush3.msra.mxu1 %v213_v14  ;;  %372 = vmatprep.subr.mxu0 %v314_v36  ;;  %v310_v40 = vld [vmem:[%s1704_s8 + $0x28] sm:$0xff]  ;;  %v312_v41 = vld [vmem:[%s1704_s8 + $0x38] sm:$0xff]  ;;  %v309_v42 = vld [vmem:[%s1704_s8 + $0x20] sm:$0xff] }
  0x24   :  { %441 = vmatprep.subr.mxu1 %v320_v33  ;;  %373 = vmatpush1.msra.mxu0 %v313_v38  ;;  %v311_v43 = vld [vmem:[%s1704_s8 + $0x30] sm:$0xff]  ;;  %v306_v44 = vld [vmem:[%s1704_s8 + $0x8] sm:$0xff]  ;;  %v308_v45 = vld [vmem:[%s1704_s8 + $0x18] sm:$0xff] }
  0x25   :  { %374 = vmatprep.subr.mxu0 %v310_v40  ;;  %v305_v46 = vld [vmem:[%s1704_s8] sm:$0xff]  ;;  %v307_v47 = vld [vmem:[%s1704_s8 + $0x10] sm:$0xff] }
  0x26   :  { %375 = vmatpush1.msra.mxu0 %v309_v42  ;;  %v992_v49 = vld [vmem:[%s1705_s7] ss:$0 sm:$0xff]  ;;  %v526_v13 = vld [vmem:[%s1666_s12 + $0xb0] sm:$0xff]  ;;  %v1003_v33 = vld [vmem:[#allocation5] ss:$0 sm:$0xff]  ;;  %s1209_s7 = smov [#allocation6]  }
  0x27   :  { %376 = vmatprep.subr.mxu0 %v306_v44  ;;  %v510_v14 = vld [vmem:[%s1666_s12 + $0x30] sm:$0xff]  ;;  %v321_v38 = vld [vmem:[%s1665_s11] sm:$0xf]  ;;  %s965_s8 = sshll.u32 %s1209_s7, 4  ;;  %s966_s8 = int_to_ptr.vmem [resolvable:$true] %s965_s8 }
  0x28   :  { %377 = vmatpush1.msra.mxu0 %v305_v46  ;;  %p1163_p1 = scmp.lt.s32.totalorder %s966_s8, %s966_s8 }
  0x29   :  { %1020 = vmatprep.subr.mxu0 %v535_v48 }
  0x90   :  { %v101_v15 = vpop.permute.xlu0 %100 }
  0x91   :  { %v109_v19 = vmul.f32 %v987_v16, %v101_v15  ;;  %v525_v15 = vld [vmem:[%s1666_s12 + $0xa8] sm:$0xff] }
  0x92   :  { %v509_v16 = vld [vmem:[%s1666_s12 + $0x28] sm:$0xff] }
  0x97   :  { %v1405_v18 = vpop.permute.xlu0 %187 }
  0x98   :  { %v196_v21 = vmul.f32 %v989_v17, %v1405_v18  ;;  %v524_v17 = vld [vmem:[%s1666_s12 + $0xa0] sm:$0xff] }
  0xd7   :  { %v180_v20 = vpop.f32.mrf.mxu0 }
  0xd8   :  { %v181_v22 = vadd.f32 %v180_v20, %v109_v19  ;;  %v508_v19 = vld [vmem:[%s1666_s12 + $0x20] sm:$0xff]  ;;  %v523_v20 = vld [vmem:[%s1666_s12 + $0x98] sm:$0xff] }
  0xd9   :  { %v1076_v24 = vpop.f32.mrf.mxu0 }
  0xda   :  { %v197_v25 = vadd.f32 %v196_v21, %v181_v22  ;;  %v507_v21 = vld [vmem:[%s1666_s12 + $0x18] sm:$0xff]  ;;  %v522_v22 = vld [vmem:[%s1666_s12 + $0x90] sm:$0xff]  ;;  %v521_v24 = vld [vmem:[%s1666_s12 + $0x88] sm:$0xff] }
  0xdc   :  { %v205_v26 = vadd.f32 %v990_v23, %v197_v25  ;;  %v506_v23 = vld [vmem:[%s1666_s12 + $0x10] sm:$0xff]  ;;  %v505_v25 = vld [vmem:[%s1666_s12 + $0x8] sm:$0xff] }
  0xde   :  { %v991_v27 = vmul.f32 -1.442695, %v205_v26 }
  0xe0   :  { %1134 = vpow2.f32 %v991_v27  ;;  %v504_v27 = vld [vmem:[%s1666_s12] sm:$0xff] }
  0xed   :  { %v1135_v28 = vpop.eup %1134 }
  0xee   :  { %v209_v29 = vadd.f32 1.0, %v1135_v28  ;;  %v1000_v28 = vld [vmem:[#allocation2] ss:$0 sm:$0xff] }
  0xf0   :  { %1136 = vrcp.f32 %v209_v29  ;;  %v1002_v29 = vld [vmem:[#allocation4] ss:$0 sm:$0xff] }
  0xf1   :  { %v660_v32 = vmul.f32 %v1002_v29, %v1377_v10  ;;  %v770_v29 = vld [vmem:[%s1671_s17 + $0x18] sm:$0xff] }
  0xfd   :  { %v1137_v30 = vpop.eup %1136 }
  0xfe   :  { %v212_v31 = vmul.f32 %v1137_v30, %v205_v26  ;;  %v520_v26 = vld [vmem:[%s1666_s12 + $0x80] sm:$0xff]  ;;  %v637_v30 = vmul.f32 %v1000_v28, %v1377_v10 }
 0x100   :  { %1086 = vmatmul.mubr.msk.f32.vlgmr.msra.gmra.mxu1 %vm224_vm2, %v212_v31  ;;  %v1001_v31 = vld [vmem:[#allocation3] ss:$0 sm:$0xff]  ;;  %639 = vrot.lane.b32.xlu1 %v637_v30, %s1205_s9  ;;  %v769_v30 = vld [vmem:[%s1671_s17 + $0x10] sm:$0xff] }
 0x101   :  { %481 = vmatprep.mubr.f32.mxu1 %v1202_v5  ;;  %442 = vmatpush1.msra.mxu1 %v319_v35  ;;  %v324_v35 = vshrl.u32 %v323_v34, 7 }
 0x102   :  { %443 = vmatprep.subr.mxu1 %v316_v37  ;;  %649 = vrot.lane.b32.xlu0 %v1001_v31, %s1205_s9  ;;  %v768_v31 = vld [vmem:[%s1671_s17 + $0x8] sm:$0xff] }
 0x103   :  { %444 = vmatpush1.msra.mxu1 %v315_v39  ;;  %v325_v36 = vsub.s32 0, %v324_v35  ;;  %v333_v37 = vsub.s32 2, %v324_v35  ;;  %v329_v39 = vsub.s32 1, %v324_v35  ;;  %v337_v40 = vsub.s32 3, %v324_v35 }
 0x104   :  { %445 = vmatprep.subr.mxu1 %v312_v41  ;;  %662 = vrot.lane.b32.xlu1 %v660_v32, %s1206_s30  ;;  %v767_v32 = vld [vmem:[%s1671_s17] sm:$0xff] }
 0x105   :  { %446 = vmatpush1.msra.mxu1 %v311_v43  ;;  %v326_v41 = vrot.slane %v321_v38, %v325_v36  ;;  %v334_v42 = vrot.slane %v321_v38, %v333_v37  ;;  %v330_v43 = vrot.slane %v321_v38, %v329_v39  ;;  %v338_v44 = vrot.slane %v321_v38, %v337_v40 }
 0x106   :  { %447 = vmatprep.subr.mxu1 %v308_v45 }
 0x107   :  { %448 = vmatpush1.msra.mxu1 %v307_v47 }
 0x108   :  { %1088 = vmatprep.subr.mxu1 %v1202_v5  ;;  %672 = vrot.lane.b32.xlu1 %v1003_v33, %s1206_s30  ;;  %v1004_v33 = vld [vmem:[%s1670_s16] ss:$0 sm:$0xff] }
 0x1c0   :  { %v294_v50 = vpop.f32.mrf.mxu1 }
 0x1c1   :  { %v295_v51 = vadd.f32 %v992_v49, %v294_v50 }
 0x1c2   :  { %v1087_v52 = vpop.f32.mrf.mxu1 }
 0x1c3   :  { %v994_v53 = vmul.f32 -1.442695, %v295_v51 }
 0x1c5   :  { %1138 = vpow2.f32 %v994_v53 }
 0x1d2   :  { %v1139_v54 = vpop.eup %1138 }
 0x1d3   :  { %v301_v55 = vadd.f32 1.0, %v1139_v54 }
 0x1d5   :  { %1140 = vrcp.f32 %v301_v55 }
 0x1e2   :  { %v1141_v56 = vpop.eup %1140 }
 0x1e3   :  { %v304_v57 = vmul.f32 %v1141_v56, %v295_v51  ;;  %v492_v56 = vld [vmem:[%s1706_s2] sm:$0xff] }
 0x1e5   :  { %995 = vmatmul.mubr.msk.f32.vlgmr.msra.gmra.mxu0 %vm224_vm2, %v304_v57  ;;  %996 = vmatmul.mubr.msk.f32.vlgmr.msra.gmra.mxu1 %vm224_vm2, %v304_v57 }
 0x1e6   :  { %1021 = vmatpush3.msra.mxu0 %v519_v58  ;;  %1096 = vmatprep.mubr.msk.f32.mxu1 %vm1203_vm0, %v1202_v5  ;;  %v493_v58 = vld [vmem:[%s1706_s2 + $0x8] sm:$0xff] }
 0x1e7   :  { %1022 = vmatprep.subr.mxu0 %v534_v59 }
 0x1e8   :  { %1023 = vmatpush3.msra.mxu0 %v518_v60 }
 0x1e9   :  { %1024 = vmatprep.subr.mxu0 %v533_v61 }
 0x1ea   :  { %1025 = vmatpush3.msra.mxu0 %v517_v62 }
 0x1eb   :  { %1026 = vmatprep.subr.mxu0 %v532_v63 }
 0x1ec   :  { %1027 = vmatpush3.msra.mxu0 %v516_v0  ;;  %v1207_v0 = vmov 33  }
 0x1ed   :  { %1028 = vmatprep.subr.mxu0 %v531_v1  ;;  %1132 = vset.pattern.permute.xlu1 %v1207_v0  ;;  %v1208_v1 = vmov 32  }
 0x1ee   :  { %1029 = vmatpush3.msra.mxu0 %v515_v2  ;;  %1131 = vset.pattern.permute.xlu0 %v1208_v1  ;;  %v679_v2 = vld [vmem:[%s1669_s15 + $0x18] sm:$0xff] }
 0x1ef   :  { %1030 = vmatprep.subr.mxu0 %v530_v3  ;;  %1089 = vmatpush3.msra.mxu1 %v679_v2  ;;  %v678_v3 = vld [vmem:[%s1669_s15 + $0x10] sm:$0xff] }
 0x1f0   :  { %1031 = vmatpush3.msra.mxu0 %v514_v4  ;;  %1090 = vmatprep.subr.mxu1 %v1202_v5  ;;  %v677_v4 = vld [vmem:[%s1669_s15 + $0x8] sm:$0xff] }
 0x1f1   :  { %1032 = vmatprep.subr.mxu0 %v529_v6  ;;  %1091 = vmatpush3.msra.mxu1 %v678_v3  ;;  %v676_v6 = vld [vmem:[%s1669_s15] sm:$0xff] }
 0x1f2   :  { %1033 = vmatpush3.msra.mxu0 %v513_v7  ;;  %1092 = vmatprep.subr.mxu1 %v1202_v5  ;;  %v640_v7 = vpop.permute.xlu1 %639 }
 0x1f3   :  { %1034 = vmatprep.subr.mxu0 %v528_v8  ;;  %1093 = vmatpush3.msra.mxu1 %v677_v4 }
 0x1f4   :  { %1035 = vmatpush3.msra.mxu0 %v512_v9  ;;  %1094 = vmatprep.subr.mxu1 %v1202_v5  ;;  %v997_v9 = vld [vmem:[%s1667_s13] ss:$0 sm:$0xff] }
 0x1f5   :  { %1036 = vmatprep.subr.mxu0 %v527_v11  ;;  %1095 = vmatpush3.msra.mxu1 %v676_v6 }
 0x1f6   :  { %1037 = vmatpush3.msra.mxu0 %v511_v12  ;;  %1099 = vmatprep.subr.mxu1 %v1202_v5  ;;  %v663_v8 = vpop.permute.xlu1 %662 }
 0x1f7   :  { %1038 = vmatprep.subr.mxu0 %v526_v13  ;;  %v613_v13 = vmul.f32 %v997_v9, %v1405_v18 }
 0x1f8   :  { %1039 = vmatpush3.msra.mxu0 %v510_v14 }
 0x1f9   :  { %1040 = vmatprep.subr.mxu0 %v525_v15  ;;  %v998_v15 = vld [vmem:[%s1668_s14] ss:$0 sm:$0xff] }
 0x1fa   :  { %1041 = vmatpush3.msra.mxu0 %v509_v16  ;;  %v673_v16 = vpop.permute.xlu1 %672 }
 0x1fb   :  { %1042 = vmatprep.subr.mxu0 %v524_v17  ;;  %v650_v17 = vpop.permute.xlu0 %649 }
 0x1fc   :  { %1043 = vmatpush3.msra.mxu0 %v508_v19 }
 0x1fd   :  { %1044 = vmatprep.subr.mxu0 %v523_v20 }
 0x1fe   :  { %1045 = vmatpush3.msra.mxu0 %v507_v21 }
 0x1ff   :  { %1046 = vmatprep.subr.mxu0 %v522_v22 }
 0x200   :  { %1047 = vmatpush3.msra.mxu0 %v506_v23 }
 0x201   :  { %1048 = vmatprep.subr.mxu0 %v521_v24 }
 0x202   :  { %1049 = vmatpush3.msra.mxu0 %v505_v25 }
 0x203   :  { %1050 = vmatprep.subr.mxu0 %v520_v26 }
 0x204   :  { %1051 = vmatpush3.msra.mxu0 %v504_v27 }
 0x2a5   :  { %v412_v10 = vpop.f32.mrf.mxu0  ;;  %v483_v45 = vpop.f32.mrf.mxu1 }
 0x2a6   :  { %v413_v46 = vadd.f32 %v412_v10, %v326_v41  ;;  %v484_v47 = vadd.f32 %v483_v45, %v334_v42  ;;  %v859_v10 = vld [vmem:[%s1673_s19 + $0x8] sm:$0xff]  ;;  %v858_v45 = vld [vmem:[%s1673_s19] sm:$0xff] }
 0x2a7   :  { %v414_v48 = vpop.f32.mrf.mxu0  ;;  %v485_v49 = vpop.f32.mrf.mxu1 }
 0x2a8   :  { %488 = vst [vmem:[#allocation6] sm:$0xff] %v413_v46  ;;  %490 = vst [vmem:[#allocation6 + $0x10] sm:$0xff] %v484_v47  ;;  %v494_v50 = vmul.f32 0.5, %v484_v47  ;;  %v415_v51 = vadd.f32 %v414_v48, %v330_v43  ;;  %v486_v52 = vadd.f32 %v485_v49, %v338_v44  ;;  %v861_v43 = vld [vmem:[%s1673_s19 + $0x18] sm:$0xff]  ;;  %v860_v44 = vld [vmem:[%s1673_s19 + $0x10] sm:$0xff]  ;;  %s1158_s19 = scalar_lea.vmem %s966_s8, 512 }
 0x2a9   :  { %p1159_p0 = scmp.ne.s32.totalorder %s966_s8, %s1158_s19  ;;  %p1164_p2 = scmp.lt.s32.totalorder %s1158_s19, %s1158_s19 }
 0x2aa   :  { %v496_v53 = vmul.f32 1.442695, %v494_v50  ;;  %489 = vst [vmem:[#allocation6 + $0x8] sm:$0xff] %v415_v51  ;;  %491 = vst [vmem:[#allocation6 + $0x18] sm:$0xff] %v486_v52  ;;  %v495_v54 = vmul.f32 0.5, %v486_v52 }
 0x2ab   :  { %p1165_p3 = por %p1164_p2, %p1163_p1 }
 0x2ac   :  { %1142 = vpow2.f32 %v496_v53  ;;  %v498_v55 = vmul.f32 1.442695, %v495_v54 }
 0x2ad   :  { %p1166_p4 = pnand %p1165_p3, %p1159_p0 }
 0x2ae   :  { %1144 = vpow2.f32 %v498_v55 }
 0x2b9   :  { %v1143_v57 = vpop.eup %1142 }
 0x2ba   :  { %v500_v60 = vmul.f32 %v1143_v57, %v492_v56 }
 0x2bb   :  { %v1145_v59 = vpop.eup %1144 }
 0x2bc   :  { %v501_v61 = vmul.f32 %v1145_v59, %v493_v58  ;;  %v502_v63 = vadd.f32 %v500_v60, %v413_v46  ;;  %v1007_v46 = vld [vmem:[%s1672_s18] ss:$0 sm:$0xff] }
 0x2be   :  { %v503_v62 = vadd.f32 %v501_v61, %v415_v51 }
 0x2c0   :  { %600 = vmatprep.mubr.f32.mxu0 %v503_v62 }
 0x2c1   :  { %601 = vmatmul.mubr.f32.vlgmr.msra.gmra.mxu0 %v502_v63 }
 0x381   :  { %v1052_v11 = vpop.f32.mrf.mxu0 }
 0x383   :  { %v1053_v12 = vpop.f32.mrf.mxu0 }
 0x384   :  { %v1054_v14 = vadd.f32 %v1053_v12, %v1052_v11 }
 0x386   :  { %v614_v19 = vadd.f32 %v1054_v14, %v613_v13  ;;  %v665_v20 = vadd.f32 %v1054_v14, %v663_v8  ;;  %v642_v21 = vadd.f32 %v1054_v14, %v640_v7 }
 0x388   :  { %v622_v22 = vadd.f32 %v998_v15, %v614_v19  ;;  %v675_v23 = vadd.f32 %v673_v16, %v665_v20  ;;  %v652_v24 = vadd.f32 %v650_v17, %v642_v21 }
 0x38a   :  { %v999_v25 = vmul.f32 -1.442695, %v622_v22  ;;  %954 = vperm.xlu1 %1132, %v675_v23   ;;  %947 = vperm.xlu0 %1131, %v652_v24  }
 0x38c   :  { %1146 = vpow2.f32 %v999_v25 }
 0x38e   :  { %1133 = vset.pattern.permute.xlu0 %v1207_v0 }
 0x399   :  { %v1147_v26 = vpop.eup %1146 }
 0x39a   :  { %v626_v18 = vadd.f32 1.0, %v1147_v26 }
 0x39c   :  { %1148 = vrcp.f32 %v626_v18 }
 0x3a9   :  { %v1149_v27 = vpop.eup %1148 }
 0x3aa   :  { %v629_v28 = vmul.f32 %v1149_v27, %v622_v22 }
 0x3ac   :  { %1097 = vmatmul.mubr.msk.f32.vlgmr.msra.gmra.mxu1 %vm224_vm2, %v629_v28 }
 0x3ad   :  { %1107 = vmatprep.mubr.msk.f32.mxu1 %vm1203_vm0, %v1202_v5  ;;  %1100 = vmatpush3.msra.mxu1 %v770_v29 }
 0x3ae   :  { %1101 = vmatprep.subr.mxu1 %v1202_v5 }
 0x3af   :  { %1102 = vmatpush3.msra.mxu1 %v769_v30 }
 0x3b0   :  { %1103 = vmatprep.subr.mxu1 %v1202_v5 }
 0x3b1   :  { %1104 = vmatpush3.msra.mxu1 %v768_v31 }
 0x3b2   :  { %1105 = vmatprep.subr.mxu1 %v1202_v5 }
 0x3b3   :  { %1106 = vmatpush3.msra.mxu1 %v767_v32 }
 0x3b4   :  { %1110 = vmatprep.subr.mxu1 %v1202_v5 }
 0x46c   :  { %v756_v35 = vpop.f32.mrf.mxu1 }
 0x46d   :  { %v757_v36 = vadd.f32 %v1004_v33, %v756_v35 }
 0x46e   :  { %v1098_v37 = vpop.f32.mrf.mxu1 }
 0x46f   :  { %v1006_v38 = vmul.f32 -1.442695, %v757_v36 }
 0x471   :  { %1150 = vpow2.f32 %v1006_v38 }
 0x47e   :  { %v1151_v39 = vpop.eup %1150 }
 0x47f   :  { %v763_v40 = vadd.f32 1.0, %v1151_v39 }
 0x481   :  { %1152 = vrcp.f32 %v763_v40 }
 0x48e   :  { %v1153_v41 = vpop.eup %1152 }
 0x48f   :  { %v766_v42 = vmul.f32 %v1153_v41, %v757_v36 }
 0x491   :  { %1108 = vmatmul.mubr.msk.f32.vlgmr.msra.gmra.mxu1 %vm224_vm2, %v766_v42 }
 0x492   :  { %1118 = vmatprep.mubr.msk.f32.mxu1 %vm1203_vm0, %v1202_v5  ;;  %1111 = vmatpush3.msra.mxu1 %v861_v43 }
 0x493   :  { %1112 = vmatprep.subr.mxu1 %v1202_v5 }
 0x494   :  { %1113 = vmatpush3.msra.mxu1 %v860_v44 }
 0x495   :  { %1114 = vmatprep.subr.mxu1 %v1202_v5 }
 0x496   :  { %1115 = vmatpush3.msra.mxu1 %v859_v10 }
 0x497   :  { %1116 = vmatprep.subr.mxu1 %v1202_v5 }
 0x498   :  { %1117 = vmatpush3.msra.mxu1 %v858_v45 }
 0x551   :  { %v847_v47 = vpop.f32.mrf.mxu1 }
 0x552   :  { %v848_v48 = vadd.f32 %v1007_v46, %v847_v47 }
 0x553   :  { %v1109_v49 = vpop.f32.mrf.mxu1 }
 0x554   :  { %v1009_v50 = vmul.f32 -1.442695, %v848_v48 }
 0x556   :  { %1154 = vpow2.f32 %v1009_v50 }
 0x563   :  { %v1155_v51 = vpop.eup %1154 }
 0x564   :  { %v854_v52 = vadd.f32 1.0, %v1155_v51 }
 0x566   :  { %1156 = vrcp.f32 %v854_v52 }
 0x573   :  { %v1157_v53 = vpop.eup %1156 }
 0x574   :  { %v857_v54 = vmul.f32 %v1157_v53, %v848_v48 }
 0x576   :  { %1119 = vmatmul.mubr.msk.f32.vlgmr.msra.gmra.mxu1 %vm224_vm2, %v857_v54 }
 0x577   :  { %1169 = shalt.err (!%p1166_p4)
}
 0x578   :  { %968 = dma.vmem_to_hbm [thread:$0]  %s966_s8, 512, %s1676_s25, [#allocation7]   ;;  %v943_v5 = vand.u32 127, %v323_v34  ;;  %v1010_v55 = vld [vmem:[%s1674_s20] ss:$0 sm:$0xff]  ;;  %v948_v58 = vpop.permute.xlu0 %947  ;;  %v955_v60 = vpop.permute.xlu1 %954 }
 0x579   :  { %s1210_s0 = smov [#allocation8]  }
 0x57a   :  { %vm944_vm3 = vcmp.eq.s32.totalorder %v943_v5, 16  ;;  %s975_s13 = sshll.u32 %s1210_s0, 4  ;;  %vm951_vm4 = vcmp.eq.s32.totalorder %v943_v5, 17  ;;  %s976_s13 = int_to_ptr.vmem [resolvable:$true] %s975_s13 }
 0x57b   :  { %s1178_s25 = scalar_lea.vmem %s976_s13, 128  ;;  %p1183_p6 = scmp.lt.s32.totalorder %s976_s13, %s976_s13 }
 0x57c   :  { %p1179_p5 = scmp.ne.s32.totalorder %s976_s13, %s1178_s25  ;;  %p1184_p7 = scmp.lt.s32.totalorder %s1178_s25, %s1178_s25 }
 0x57e   :  { %p1185_p8 = por %p1184_p7, %p1183_p6 }
 0x580   :  { %p1186_p9 = pnand %p1185_p8, %p1179_p5 }
 0x636   :  { %v938_v56 = vpop.f32.mrf.mxu1 }
 0x637   :  { %v939_v57 = vadd.f32 %v1010_v55, %v938_v56 }
 0x638   :  { %v1120_v59 = vpop.f32.mrf.mxu1 }
 0x639   :  { %v950_v61 = vsel %vm944_vm3, %v948_v58, %v939_v57 }
 0x63a   :  { %v957_v62 = vsel %vm951_vm4, %v955_v60, %v950_v61 }
 0x63b   :  { %958 = vst [vmem:[#allocation8] sm:$0xff] %v957_v62 }
 0x63c   :  { %1189 = shalt.err (!%p1186_p9)
}
 0x63d   :  { %978 = dma.vmem_to_hbm [thread:$0]  %s976_s13, 128, %s1677_s26, [#allocation9]  }
 0x63e   :  { %1198 = dma.done.wait [#allocation7], 512  }
 0x63f   :  { %1199 = vsyncadd [#allocation7], 4294966784 }
 0x640   :  { %1200 = dma.done.wait [#allocation9], 128  }
 0x641   :  { %1201 = vsyncadd [#allocation9], 4294967168 }
 0x642   :  { %985 = vsyncpa [#allocation7], 1 }
 0x643   :  { %986 = vsyncpa [#allocation9], 1 }

</bundles_post_ra>
